<compile_context>
chip_gen: v7x
topology: tpu7x:2x2x1
jax: 0.10.0
libtpu: 0.0.40
codegen_flags: <defaults>
</compile_context>

<pallas_src>
import functools

import jax
import jax.numpy as jnp
import numpy as np
from jax.experimental import pallas as pl
from jax.experimental.pallas import tpu as pltpu

B, C, H, W = 2, 4, 16, 16
_LANES = 128  # lane-dense last dim; pad granularity is one lane row


def _bce_mean_kernel(yt_ref, yp_ref, out_ref, *, n, total, neg_inv_n):
    yt = yt_ref[...]                                      # (rows, 128) f32
    yp = yp_ref[...]
    # PyTorch clamps the log terms at -100 to avoid -inf / NaN propagation.
    log_p = jnp.maximum(jnp.log(yp), jnp.float32(-100.0))
    log_1mp = jnp.maximum(jnp.log(1.0 - yp), jnp.float32(-100.0))
    # Folded BCE:  -(yt*log_p + (1-yt)*log_1mp) = -(log_1mp + yt*(log_p - log_1mp))
    contrib = log_1mp + yt * (log_p - log_1mp)
    if total != n:  # static (trace-time) branch: mask the padded tail
        rows, lanes = contrib.shape
        flat_idx = (jax.lax.broadcasted_iota(jnp.int32, (rows, lanes), 0) * lanes
                    + jax.lax.broadcasted_iota(jnp.int32, (rows, lanes), 1))
        contrib = jnp.where(flat_idx < n, contrib, jnp.float32(0.0))
    # Single cross-lane reduce; the negate and mean ride on the scalar scale.
    out_ref[0, 0] = jnp.sum(contrib) * jnp.float32(neg_inv_n)


@jax.jit
def binary_cross_entropy(y_true, y_pred):
    """Mean binary cross entropy, mirroring F.binary_cross_entropy."""
    n = y_true.size                       # static under jit
    yt = jnp.ravel(y_true).astype(jnp.float32)
    yp = jnp.ravel(y_pred).astype(jnp.float32)

    # Pad (only if needed) to a lane-dense multiple of 128; the tail is
    # masked inside the kernel, so the pad value is irrelevant.
    pad = (-n) % _LANES
    total = n + pad
    if pad:
        yt = jnp.pad(yt, (0, pad))
        yp = jnp.pad(yp, (0, pad))
    rows = total // _LANES
    yt2 = yt.reshape(rows, _LANES)
    yp2 = yp.reshape(rows, _LANES)

    kernel = functools.partial(_bce_mean_kernel, n=n, total=total,
                               neg_inv_n=-1.0 / n)
    out = pl.pallas_call(
        kernel,
        out_shape=jax.ShapeDtypeStruct((1, 1), jnp.float32),
        # Gridless: whole arrays resident in VMEM, scalar result in SMEM.
        in_specs=[
            pl.BlockSpec(memory_space=pltpu.MemorySpace.VMEM),
            pl.BlockSpec(memory_space=pltpu.MemorySpace.VMEM),
        ],
        out_specs=pl.BlockSpec(memory_space=pltpu.MemorySpace.SMEM),
        cost_estimate=pl.CostEstimate(
            flops=6 * n, transcendentals=2 * n, bytes_accessed=8 * n + 4),
    )(yt2, yp2)
    return out.reshape(())                # trace-time squeeze, fuses under jit


if __name__ == "__main__":
    key = jax.random.PRNGKey(0)
    k1, k2 = jax.random.split(key)
    # y_pred must be probabilities in (0, 1); y_true soft targets in [0, 1].
    y_pred = jax.nn.sigmoid(jax.random.normal(k1, (B, C, H, W), jnp.float32))
    y_true = jax.random.uniform(k2, (B, C, H, W), dtype=jnp.float32)

    loss = binary_cross_entropy(y_true, y_pred)
    loss = jax.block_until_ready(loss)

    # Pure-JAX reference mirroring F.binary_cross_entropy (mean reduction).
    log_p = jnp.maximum(jnp.log(y_pred), -100.0)
    log_1mp = jnp.maximum(jnp.log(1.0 - y_pred), -100.0)
    ref = jnp.mean(-(y_true * log_p + (1.0 - y_true) * log_1mp))

    np.testing.assert_allclose(np.asarray(loss), np.asarray(ref),
                               rtol=1e-5, atol=1e-6)
    print("KERNEL_OK")
</pallas_src>

<mosaic_0001>
module attributes {stable_mosaic.version = 11 : i64} {
  func.func @_bce_mean_kernel(%arg0: memref<16x128xf32, #tpu.memory_space<vmem>>, %arg1: memref<16x128xf32, #tpu.memory_space<vmem>>, %arg2: memref<1x1xf32, #tpu.memory_space<smem>>) attributes {dimension_semantics = [], scalar_prefetch = 0 : i64, scratch_operands = 0 : i64, tpu.core_type = #tpu.core_type<tc>} {
    %c0 = arith.constant 0 : index
    %c0_0 = arith.constant 0 : index
    %0 = vector.load %arg0[%c0, %c0_0] : memref<16x128xf32, #tpu.memory_space<vmem>>, vector<16x128xf32>
    %c0_1 = arith.constant 0 : index
    %c0_2 = arith.constant 0 : index
    %1 = vector.load %arg1[%c0_1, %c0_2] : memref<16x128xf32, #tpu.memory_space<vmem>>, vector<16x128xf32>
    %2 = math.log %1 : vector<16x128xf32>
    %cst = arith.constant -1.000000e+02 : f32
    %3 = vector.broadcast %cst : f32 to vector<16x128xf32>
    %4 = arith.maximumf %2, %3 : vector<16x128xf32>
    %cst_3 = arith.constant 1.000000e+00 : f32
    %5 = vector.broadcast %cst_3 : f32 to vector<16x128xf32>
    %6 = arith.subf %5, %1 : vector<16x128xf32>
    %7 = math.log %6 : vector<16x128xf32>
    %cst_4 = arith.constant -1.000000e+02 : f32
    %8 = vector.broadcast %cst_4 : f32 to vector<16x128xf32>
    %9 = arith.maximumf %7, %8 : vector<16x128xf32>
    %10 = arith.subf %4, %9 : vector<16x128xf32>
    %11 = arith.mulf %0, %10 : vector<16x128xf32>
    %12 = arith.addf %9, %11 : vector<16x128xf32>
    %13 = vector.shape_cast %12 : vector<16x128xf32> to vector<1x16x128xf32>
    %cst_5 = arith.constant dense<0.000000e+00> : vector<1xf32>
    %14 = vector.multi_reduction <add>, %13, %cst_5 [1, 2] : vector<1x16x128xf32> to vector<1xf32>
    %15 = vector.shape_cast %14 : vector<1xf32> to vector<1x1x1xf32>
    %16 = vector.extract %15[0, 0, 0] : f32 from vector<1x1x1xf32>
    %cst_6 = arith.constant -4.8828125E-4 : f32
    %17 = arith.mulf %16, %cst_6 : f32
    %c0_7 = arith.constant 0 : index
    %c0_8 = arith.constant 0 : index
    %18 = memref.load %arg2[%c0_7, %c0_8] : memref<1x1xf32, #tpu.memory_space<smem>>
    memref.store %17, %arg2[%c0_7, %c0_8] : memref<1x1xf32, #tpu.memory_space<smem>>
    return
  }
}

</mosaic_0001>

<bundles_post_ra>
// kernel: binary_cross_entropy.1
= control target key start
LH: loop header
LB: loop body
LE: loop exit
PB: predicated region body
PF: predicated region fallthrough
CT: control target
= control target key end

     0   :  { %s125_s0 = inlined_call_operand.vmem [shape: f32[16,128], index: 0, kind: input, shape index: {}]   ;;  %s126_s1 = inlined_call_operand.vmem [shape: f32[16,128], index: 1, kind: input, shape index: {}]   ;;  %s127_s2 = inlined_call_operand.hbm [shape: f32[1,1], index: 2, kind: output, shape index: {}]  }
   0x1   :  { %v14_v0 = vld [vmem:[%s126_s1] sm:$0xff]  ;;  %v15_v1 = vld [vmem:[%s126_s1 + $0x8] sm:$0xff] }
   0x2   :  { %65 = vlog2.f32 %v14_v0  ;;  %v22_v2 = vsub.f32 1.0, %v14_v0 }
   0x3   :  { %7 = vsyncpa [#allocation3], 0  ;;  %67 = vlog2.f32 %v15_v1  ;;  %v23_v3 = vsub.f32 1.0, %v15_v1  ;;  %v12_v15 = vld [vmem:[%s125_s0] sm:$0xff]  ;;  %v13_v17 = vld [vmem:[%s125_s0 + $0x8] sm:$0xff]  ;;  %s73_s19 = scalar_lea.hbm %s127_s2, 16 }
   0x4   :  { %69 = vlog2.f32 %v22_v2  ;;  %p74_p0 = scmp.ne.s32.totalorder %s127_s2, %s73_s19  ;;  %p77_p1 = scmp.lt.u32.totalorder %s73_s19, %s127_s2 }
   0x5   :  { %71 = vlog2.f32 %v23_v3 }
   0x6   :  { %p79_p2 = pnand %p77_p1, %p74_p0 }
   0xc   :  { %v66_v4 = vpop.eup %65 }
   0xd   :  { %v68_v5 = vpop.eup %67  ;;  %v17_v6 = vmul.f32 0.6931472, %v66_v4 }
   0xe   :  { %v70_v7 = vpop.eup %69  ;;  %v19_v8 = vmul.f32 0.6931472, %v68_v5 }
   0xf   :  { %v72_v9 = vpop.eup %71  ;;  %v20_v10 = vmax.f32 %v17_v6, -100.0  ;;  %v25_v11 = vmul.f32 0.6931472, %v70_v7 }
  0x10   :  { %v21_v12 = vmax.f32 %v19_v8, -100.0  ;;  %v27_v13 = vmul.f32 0.6931472, %v72_v9 }
  0x11   :  { %v28_v14 = vmax.f32 %v25_v11, -100.0 }
  0x12   :  { %v29_v16 = vmax.f32 %v27_v13, -100.0 }
  0x13   :  { %v30_v18 = vsub.f32 %v20_v10, %v28_v14 }
  0x14   :  { %v31_v19 = vsub.f32 %v21_v12, %v29_v16 }
  0x15   :  { %v32_v20 = vmul.f32 %v30_v18, %v12_v15 }
  0x16   :  { %v33_v21 = vmul.f32 %v31_v19, %v13_v17 }
  0x17   :  { %v34_v22 = vadd.f32 %v32_v20, %v28_v14 }
  0x18   :  { %v35_v23 = vadd.f32 %v33_v21, %v29_v16 }
  0x1a   :  { %v36_v24 = vadd.f32 %v35_v23, %v34_v22 }
  0x1c   :  { %37 = vadd.xlane.f32.xlu0 %v36_v24 }
  0xa9   :  { %v38_v25 = vpop.xlane.xlu0 %37 }
  0xaa   :  { %v39_v26 = vrot.slane %v38_v25, 4 }
  0xac   :  { %v40_v27 = vadd.f32 %v39_v26, %v38_v25 }
  0xae   :  { %v41_v28 = vrot.slane %v40_v27, 2 }
  0xb0   :  { %v42_v29 = vadd.f32 %v41_v28, %v40_v27 }
  0xb2   :  { %v43_v30 = vrot.slane %v42_v29, 1 }
  0xb4   :  { %v44_v31 = vadd.f32 %v43_v30, %v42_v29 }
  0xb6   :  { %62 = vpush %v44_v31 }
  0xe7   :  { %s63_s16 = spop %62 }
  0xe8   :  { %s46_s17 = smul.f32 -0.00048828125, %s63_s16 }
  0xea   :  { %48 = sst [smem:[#allocation2]] %s46_s17 }
  0xeb   :  { %82 = shalt.err (!%p79_p2)
}
  0xec   :  { %s85_s24 = smov [#allocation2]  }
  0xed   :  { %56 = dma.smem_to_hbm %s85_s24, 16, %s127_s2, [#allocation3]  }
  0xee   :  { %83 = dma.done.wait [#allocation3], 16  }
  0xef   :  { %84 = vsyncadd [#allocation3], 4294967280 }
  0xf0   :  { %60 = sfence }
  0xf1   :  { %61 = vsyncpa [#allocation3], 1 }

</bundles_post_ra>
